<compile_context>
chip_gen: v5e
topology: v5e:2x2
jax: 0.10.0
libtpu: 0.0.40
codegen_flags: <defaults>
</compile_context>

<pallas_src>
import jax
import jax.numpy as jnp
from jax.experimental import pallas as pl
from jax.experimental.pallas import tpu as pltpu


def _embed_kernel(idx_ref, table_ref, out_ref):
    # idx_ref:   (tok_per_step, 1) int32 tile of token ids (VMEM)
    # table_ref: (d_model, vocab_pad) full embedding table (VMEM, resident)
    # out_ref:   (tok_per_step, vocab_pad) output tile (VMEM)
    tok = idx_ref.shape[0]
    d_model = table_ref.shape[0]

    # One-hot gather on the MXU: (tok, d_model) @ (d_model, vocab) -> (tok, vocab)
    rows = jax.lax.broadcasted_iota(jnp.int32, (tok, d_model), 1)
    one_hot = (idx_ref[...] == rows).astype(table_ref.dtype)
    out_ref[...] = jnp.dot(
        one_hot, table_ref[...], preferred_element_type=jnp.float32
    ).astype(out_ref.dtype)


def word_embedding(indices, table, *, tok_per_step=256):
    """indices: (B, S) int; table: (d_model, vocab) float -> (B, S, vocab)."""
    B, S = indices.shape
    d_model, vocab = table.shape

    # Lane-dense output: pad embedding dim to a multiple of 128.
    vocab_pad = 128 * pl.cdiv(vocab, 128)
    if vocab_pad != vocab:
        table = jnp.pad(table, ((0, 0), (0, vocab_pad - vocab)))

    # Flatten + pad token count to a multiple of tok_per_step (pad with a valid
    # index; padded rows are sliced away below).  Clamp indices for safety —
    # VMEM refs have no runtime bounds check.
    n_tok = B * S
    n_blocks = pl.cdiv(n_tok, tok_per_step)
    n_tok_pad = n_blocks * tok_per_step
    flat_idx = jnp.clip(indices.reshape(n_tok).astype(jnp.int32), 0, d_model - 1)
    if n_tok_pad != n_tok:
        flat_idx = jnp.pad(flat_idx, (0, n_tok_pad - n_tok))
    idx2d = flat_idx.reshape(n_tok_pad, 1)

    itemsize = jnp.dtype(table.dtype).itemsize
    table_bytes = d_model * vocab_pad * itemsize
    out_tile_bytes = tok_per_step * vocab_pad * itemsize
    idx_tile_bytes = tok_per_step * 4
    vmem_limit = min(
        100 * 1024 * 1024,
        2 * table_bytes + 2 * out_tile_bytes + 2 * idx_tile_bytes + (4 << 20),
    )

    out_flat = pl.pallas_call(
        _embed_kernel,
        out_shape=jax.ShapeDtypeStruct((n_tok_pad, vocab_pad), table.dtype),
        grid=(n_blocks,),
        in_specs=[
            # Per-step index tile: keeps on-chip index footprint constant.
            pl.BlockSpec((tok_per_step, 1), lambda i: (i, 0)),
            # Whole table resident in VMEM; constant index_map -> fetched once.
            pl.BlockSpec((d_model, vocab_pad), lambda i: (0, 0)),
        ],
        out_specs=pl.BlockSpec((tok_per_step, vocab_pad), lambda i: (i, 0)),
        compiler_params=pltpu.CompilerParams(
            dimension_semantics=("parallel",),
            vmem_limit_bytes=int(vmem_limit),
        ),
    )(idx2d, table)

    return out_flat[:n_tok, :vocab].reshape(B, S, vocab)


if __name__ == "__main__":
    # Small shapes consistent with the module's forward semantics.
    d_model = 32      # num_embeddings (rows of the table)
    vocab_size = 128  # embedding_dim (output feature width)
    B, S = 2, 8

    key = jax.random.PRNGKey(0)
    k_tab, k_idx = jax.random.split(key)

    # nn.Embedding default init: weight ~ N(0, 1), shape (d_model, vocab_size)
    table = jax.random.normal(k_tab, (d_model, vocab_size), dtype=jnp.float32)
    indices = jax.random.randint(k_idx, (B, S), 0, d_model, dtype=jnp.int32)

    out = word_embedding(indices, table)
    out = jax.block_until_ready(out)

    # Reference check against plain-JAX gather.
    ref = table[indices]
    assert out.shape == (B, S, vocab_size)
    assert jnp.allclose(out, ref), "mismatch vs reference gather"

    print("KERNEL_OK")
</pallas_src>

<mosaic_0001>
module attributes {stable_mosaic.version = 11 : i64} {
  func.func @_embed_kernel(%arg0: i32, %arg1: memref<256x1xi32, #tpu.memory_space<vmem>>, %arg2: memref<32x128xf32, #tpu.memory_space<vmem>>, %arg3: memref<256x128xf32, #tpu.memory_space<vmem>>) attributes {dimension_semantics = [#tpu.dimension_semantics<parallel>], iteration_bounds = array<i64: 1>, scalar_prefetch = 0 : i64, scratch_operands = 0 : i64, tpu.core_type = #tpu.core_type<tc>, window_params = [{transform_indices = @transform_0, window_bounds = array<i64: 256, 1>}, {pipeline_mode = #tpu.pipeline_mode<synchronous>, transform_indices = @transform_1, window_bounds = array<i64: 32, 128>}, {transform_indices = @transform_2, window_bounds = array<i64: 256, 128>}]} {
    %0 = tpu.iota {dimensions = array<i32: 1>} : vector<256x32xi32>
    %c0 = arith.constant 0 : index
    %c0_0 = arith.constant 0 : index
    %1 = vector.load %arg1[%c0, %c0_0] : memref<256x1xi32, #tpu.memory_space<vmem>>, vector<256x1xi32>
    %2 = vector.broadcast %1 : vector<256x1xi32> to vector<256x32xi32>
    %3 = arith.cmpi eq, %2, %0 : vector<256x32xi32>
    %4 = arith.extui %3 : vector<256x32xi1> to vector<256x32xi32>
    %5 = arith.sitofp %4 : vector<256x32xi32> to vector<256x32xf32>
    %c0_1 = arith.constant 0 : index
    %c0_2 = arith.constant 0 : index
    %6 = vector.load %arg2[%c0_1, %c0_2] : memref<32x128xf32, #tpu.memory_space<vmem>>, vector<32x128xf32>
    %cst = arith.constant dense<0.000000e+00> : vector<256x128xf32>
    %7 = tpu.matmul %5, %6, %cst {dimension_numbers = #tpu.dot_dimension_numbers<[1], [0], [0], [1], [0, 0, 1, 1], [], []>} : vector<256x32xf32>, vector<32x128xf32>, vector<256x128xf32> -> vector<256x128xf32>
    %c0_3 = arith.constant 0 : index
    %c0_4 = arith.constant 0 : index
    %8 = vector.load %arg3[%c0_3, %c0_4] : memref<256x128xf32, #tpu.memory_space<vmem>>, vector<256x128xf32>
    tpu.vector_store %arg3[%c0_3, %c0_4], %7 {strides = array<i32>} : memref<256x128xf32, #tpu.memory_space<vmem>>, vector<256x128xf32>,
    return
  }
  func.func @transform_0(%arg0: i32) -> (i32, i32) {
    %c0_i32 = arith.constant 0 : i32
    %c0_i32_0 = arith.constant 0 : i32
    return %arg0, %c0_i32 : i32, i32
  }
  func.func @transform_1(%arg0: i32) -> (i32, i32) {
    %c0_i32 = arith.constant 0 : i32
    %c0_i32_0 = arith.constant 0 : i32
    %c0_i32_1 = arith.constant 0 : i32
    return %c0_i32, %c0_i32_0 : i32, i32
  }
  func.func @transform_2(%arg0: i32) -> (i32, i32) {
    %c0_i32 = arith.constant 0 : i32
    %c0_i32_0 = arith.constant 0 : i32
    return %arg0, %c0_i32 : i32, i32
  }
}

</mosaic_0001>

<bundles_post_ra>
// kernel: tpu_custom_call.1
= control target key start
LH: loop header
LB: loop body
LE: loop exit
PB: predicated region body
PF: predicated region fallthrough
CT: control target
= control target key end

     0   :  { %v612_v3 = vmov 0   ;;  %s841_s0 = inlined_call_operand.vmem [shape: s32[256,1], index: 0, kind: input, shape index: {}]   ;;  %s842_s1 = inlined_call_operand.vmem [shape: f32[32,128], index: 1, kind: input, shape index: {}]   ;;  %s843_s2 = inlined_call_operand.hbm [shape: f32[256,128], index: 2, kind: output, shape index: {}]  }
   0x1   :  { %v31_v0 = vld [vmem:[%s841_s0 + $0x88] sm:$0xff]  ;;  %v30_v1 = vld [vmem:[%s841_s0 + $0x80] sm:$0xff]  ;;  %585 = vset.pattern.permute.xlu2 %v612_v3  ;;  %584 = vset.pattern.permute.xlu1 %v612_v3 }
   0x2   :  { %v14_v2 = vld [vmem:[%s841_s0] sm:$0xff]  ;;  %583 = vset.pattern.permute.xlu0 %v612_v3  ;;  %98 = vperm.xlu2 %585, %v31_v0  }
   0x3   :  { %95 = vperm.xlu0 %583, %v30_v1   ;;  %47 = vperm.xlu1 %584, %v14_v2  }
   0x4   :  { %7 = vsyncpa [#allocation3], 0  ;;  %v39_v4 = vld [vmem:[%s841_s0 + $0xc8] sm:$0xff]  ;;  %v38_v5 = vld [vmem:[%s841_s0 + $0xc0] sm:$0xff]  ;;  %v12_v39 = vlaneseq  ;;  %vm242_vm0 = vcmask 261120   ;;  %v613_v44 = vmov 0.0  }
   0x5   :  { %v22_v6 = vld [vmem:[%s841_s0 + $0x40] sm:$0xff]  ;;  %v32_v7 = vld [vmem:[%s841_s0 + $0x90] sm:$0xff]  ;;  %v15_v8 = vld [vmem:[%s841_s0 + $0x8] sm:$0xff]  ;;  %s490_s27 = sshll.u32 %s843_s2, 4  ;;  %s615_s28 = smov 128   ;;  %s491_s27 = int_to_ptr.hbm [resolvable:$true] %s490_s27 }
   0x6   :  { %v23_v9 = vld [vmem:[%s841_s0 + $0x48] sm:$0xff]  ;;  %v24_v10 = vld [vmem:[%s841_s0 + $0x50] sm:$0xff]  ;;  %v17_v13 = vld [vmem:[%s841_s0 + $0x18] sm:$0xff]  ;;  %v740_v40 = vand.u32 127, %v12_v39  ;;  %s616_s29 = smov 8  }
   0x7   :  { %v40_v11 = vld [vmem:[%s841_s0 + $0xd0] sm:$0xff]  ;;  %v33_v14 = vld [vmem:[%s841_s0 + $0x98] sm:$0xff]  ;;  %v42_v16 = vld [vmem:[%s841_s0 + $0xe0] sm:$0xff] }
   0x8   :  { %v16_v12 = vld [vmem:[%s841_s0 + $0x10] sm:$0xff]  ;;  %v41_v15 = vld [vmem:[%s841_s0 + $0xd8] sm:$0xff]  ;;  %v34_v18 = vld [vmem:[%s841_s0 + $0xa0] sm:$0xff] }
   0x9   :  { %v25_v17 = vld [vmem:[%s841_s0 + $0x58] sm:$0xff]  ;;  %v35_v19 = vld [vmem:[%s841_s0 + $0xa8] sm:$0xff]  ;;  %v18_v20 = vld [vmem:[%s841_s0 + $0x20] sm:$0xff] }
   0xa   :  { %122 = vperm.xlu2 %585, %v39_v4   ;;  %v26_v21 = vld [vmem:[%s841_s0 + $0x60] sm:$0xff]  ;;  %v27_v22 = vld [vmem:[%s841_s0 + $0x68] sm:$0xff]  ;;  %v20_v25 = vld [vmem:[%s841_s0 + $0x30] sm:$0xff] }
   0xb   :  { %119 = vperm.xlu0 %583, %v38_v5   ;;  %71 = vperm.xlu1 %584, %v22_v6   ;;  %v43_v23 = vld [vmem:[%s841_s0 + $0xe8] sm:$0xff]  ;;  %v36_v26 = vld [vmem:[%s841_s0 + $0xb0] sm:$0xff]  ;;  %v45_v28 = vld [vmem:[%s841_s0 + $0xf8] sm:$0xff] }
   0xc   :  { %v19_v24 = vld [vmem:[%s841_s0 + $0x28] sm:$0xff]  ;;  %v44_v27 = vld [vmem:[%s841_s0 + $0xf0] sm:$0xff]  ;;  %v37_v30 = vld [vmem:[%s841_s0 + $0xb8] sm:$0xff] }
   0xd   :  { %v28_v29 = vld [vmem:[%s841_s0 + $0x70] sm:$0xff]  ;;  %v241_v31 = vld [vmem:[%s842_s1 + $0x18] sm:$0xff]  ;;  %v239_v35 = vld [vmem:[%s842_s1 + $0x8] sm:$0xff] }
   0xe   :  { %v240_v32 = vld [vmem:[%s842_s1 + $0x10] sm:$0xff]  ;;  %351 = vmatpush.msra.mxu0 %v241_v31  ;;  %567 = vmatpush.msra.mxu2 %v241_v31  ;;  %v21_v33 = vld [vmem:[%s841_s0 + $0x38] sm:$0xff]  ;;  %v238_v36 = vld [vmem:[%s842_s1] sm:$0xff] }
   0xf   :  { %v29_v34 = vld [vmem:[%s841_s0 + $0x78] sm:$0xff]  ;;  %566 = vmatpush.msra.mxu1 %v241_v31  ;;  %568 = vmatpush.msra.mxu3 %v241_v31  ;;  %s614_s0 = smov [#allocation2]  }
  0x10   :  { %352 = vmatpush.msra.mxu0 %v240_v32  ;;  %570 = vmatpush.msra.mxu2 %v240_v32  ;;  %s488_s1 = sshll.u32 %s614_s0, 4  ;;  %s489_s1 = int_to_ptr.vmem [resolvable:$true] %s488_s1 }
  0x11   :  { %569 = vmatpush.msra.mxu1 %v240_v32  ;;  %571 = vmatpush.msra.mxu3 %v240_v32 }
  0x12   :  { %101 = vperm.xlu2 %585, %v32_v7   ;;  %353 = vmatpush.msra.mxu0 %v239_v35 }
  0x13   :  { %50 = vperm.xlu0 %583, %v15_v8   ;;  %74 = vperm.xlu1 %584, %v23_v9  }
  0x14   :  { %573 = vmatpush.msra.mxu2 %v239_v35  ;;  %572 = vmatpush.msra.mxu1 %v239_v35 }
  0x15   :  { %574 = vmatpush.msra.mxu3 %v239_v35  ;;  %354 = vmatpush.msra.mxu0 %v238_v36 }
  0x16   :  { %576 = vmatpush.msra.mxu2 %v238_v36  ;;  %575 = vmatpush.msra.mxu1 %v238_v36 }
  0x17   :  { %577 = vmatpush.msra.mxu3 %v238_v36 }
  0x1a   :  { %77 = vperm.xlu2 %585, %v24_v10  }
  0x1b   :  { %125 = vperm.xlu0 %583, %v40_v11   ;;  %53 = vperm.xlu1 %584, %v16_v12  }
  0x22   :  { %56 = vperm.xlu2 %585, %v17_v13  }
  0x23   :  { %104 = vperm.xlu0 %583, %v33_v14   ;;  %128 = vperm.xlu1 %584, %v41_v15  }
  0x2a   :  { %131 = vperm.xlu2 %585, %v42_v16  }
  0x2b   :  { %80 = vperm.xlu0 %583, %v25_v17   ;;  %107 = vperm.xlu1 %584, %v34_v18  }
  0x32   :  { %110 = vperm.xlu2 %585, %v35_v19  }
  0x33   :  { %59 = vperm.xlu0 %583, %v18_v20   ;;  %83 = vperm.xlu1 %584, %v26_v21  }
  0x3a   :  { %86 = vperm.xlu2 %585, %v27_v22  }
  0x3b   :  { %134 = vperm.xlu0 %583, %v43_v23   ;;  %62 = vperm.xlu1 %584, %v19_v24  }
  0x42   :  { %65 = vperm.xlu2 %585, %v20_v25  }
  0x43   :  { %113 = vperm.xlu0 %583, %v36_v26   ;;  %137 = vperm.xlu1 %584, %v44_v27  }
  0x4a   :  { %140 = vperm.xlu2 %585, %v45_v28  }
  0x4b   :  { %89 = vperm.xlu0 %583, %v28_v29   ;;  %116 = vperm.xlu1 %584, %v37_v30  }
  0x53   :  { %68 = vperm.xlu0 %583, %v21_v33   ;;  %92 = vperm.xlu1 %584, %v29_v34  }
  0x5c   :  { %v99_v37 = vpop.permute.xlu2 %98 }
  0x5d   :  { %vm159_vm3 = vcmp.eq.s32.totalorder %v99_v37, %v740_v40 }
  0x5e   :  { %v519_v50 = vsel %vm159_vm3, 1.0, %v613_v44 }
  0x64   :  { %v123_v38 = vpop.permute.xlu2 %122 }
  0x65   :  { %vm167_vm6 = vcmp.eq.s32.totalorder %v123_v38, %v740_v40 }
  0x66   :  { %v527_v57 = vsel %vm167_vm6, 1.0, %v613_v44 }
  0x6c   :  { %v102_v41 = vpop.permute.xlu2 %101 }
  0x6d   :  { %vm160_vm7 = vcmp.eq.s32.totalorder %v102_v41, %v740_v40 }
  0x6e   :  { %v520_v58 = vsel %vm160_vm7, 1.0, %v613_v44 }
  0x74   :  { %v78_v49 = vpop.permute.xlu2 %77 }
  0x75   :  { %v96_v42 = vpop.permute.xlu0 %95  ;;  %v48_v43 = vpop.permute.xlu1 %47  ;;  %vm152_vm10 = vcmp.eq.s32.totalorder %v78_v49, %v740_v40 }
  0x76   :  { %vm158_vm1 = vcmp.eq.s32.totalorder %v96_v42, %v740_v40  ;;  %vm142_vm2 = vcmp.eq.s32.totalorder %v48_v43, %v740_v40  ;;  %v512_v62 = vsel %vm152_vm10, 1.0, %v613_v44 }
  0x77   :  { %v518_v45 = vsel %vm158_vm1, 1.0, %v613_v44  ;;  %v502_v46 = vsel %vm142_vm2, 1.0, %v613_v44 }
  0x78   :  { %534 = vmatmul.msk.f32.vlgmr.msra.gmra.mxu0 %vm242_vm0, %v502_v46  ;;  %550 = vmatmul.msk.f32.vlgmr.msra.gmra.mxu2 %vm242_vm0, %v518_v45 }
  0x7c   :  { %v57_v59 = vpop.permute.xlu2 %56 }
  0x7d   :  { %v120_v47 = vpop.permute.xlu0 %119  ;;  %v72_v48 = vpop.permute.xlu1 %71  ;;  %vm145_vm13 = vcmp.eq.s32.totalorder %v57_v59, %v740_v40 }
  0x7e   :  { %vm166_vm4 = vcmp.eq.s32.totalorder %v120_v47, %v740_v40  ;;  %vm150_vm5 = vcmp.eq.s32.totalorder %v72_v48, %v740_v40  ;;  %v505_v4 = vsel %vm145_vm13, 1.0, %v613_v44 }
  0x7f   :  { %v526_v51 = vsel %vm166_vm4, 1.0, %v613_v44  ;;  %v510_v52 = vsel %vm150_vm5, 1.0, %v613_v44 }
  0x80   :  { %542 = vmatmul.msk.f32.vlgmr.msra.gmra.mxu1 %vm242_vm0, %v510_v52  ;;  %551 = vmatmul.msk.f32.gmra.mxu2 %vm242_vm0, %v519_v50 }
  0x81   :  { %558 = vmatmul.msk.f32.vlgmr.msra.gmra.mxu3 %vm242_vm0, %v526_v51 }
  0x84   :  { %v132_v1 = vpop.permute.xlu2 %131 }
  0x85   :  { %v51_v53 = vpop.permute.xlu0 %50  ;;  %v75_v54 = vpop.permute.xlu1 %74  ;;  %vm170_vm1 = vcmp.eq.s32.totalorder %v132_v1, %v740_v40 }
  0x86   :  { %vm143_vm8 = vcmp.eq.s32.totalorder %v51_v53, %v740_v40  ;;  %vm151_vm9 = vcmp.eq.s32.totalorder %v75_v54, %v740_v40  ;;  %v530_v12 = vsel %vm170_vm1, 1.0, %v613_v44 }
  0x87   :  { %v503_v55 = vsel %vm143_vm8, 1.0, %v613_v44  ;;  %v511_v56 = vsel %vm151_vm9, 1.0, %v613_v44 }
  0x88   :  { %535 = vmatmul.msk.f32.gmra.mxu0 %vm242_vm0, %v503_v55  ;;  %543 = vmatmul.msk.f32.gmra.mxu1 %vm242_vm0, %v511_v56 }
  0x89   :  { %552 = vmatmul.msk.f32.gmra.mxu2 %vm242_vm0, %v520_v58  ;;  %559 = vmatmul.msk.f32.gmra.mxu3 %vm242_vm0, %v527_v57 }
  0x8c   :  { %v111_v7 = vpop.permute.xlu2 %110 }
  0x8d   :  { %v126_v60 = vpop.permute.xlu0 %125  ;;  %v54_v61 = vpop.permute.xlu1 %53  ;;  %vm163_vm4 = vcmp.eq.s32.totalorder %v111_v7, %v740_v40 }
  0x8e   :  { %vm168_vm11 = vcmp.eq.s32.totalorder %v126_v60, %v740_v40  ;;  %vm144_vm12 = vcmp.eq.s32.totalorder %v54_v61, %v740_v40  ;;  %v523_v18 = vsel %vm163_vm4, 1.0, %v613_v44 }
  0x8f   :  { %v528_v63 = vsel %vm168_vm11, 1.0, %v613_v44  ;;  %v504_v0 = vsel %vm144_vm12, 1.0, %v613_v44 }
  0x90   :  { %536 = vmatmul.msk.f32.gmra.mxu0 %vm242_vm0, %v504_v0  ;;  %544 = vmatmul.msk.f32.gmra.mxu1 %vm242_vm0, %v512_v62 }
  0x91   :  { %560 = vmatmul.msk.f32.gmra.mxu3 %vm242_vm0, %v528_v63 }
  0x94   :  { %v87_v15 = vpop.permute.xlu2 %86 }
  0x95   :  { %v105_v2 = vpop.permute.xlu0 %104  ;;  %v129_v3 = vpop.permute.xlu1 %128  ;;  %vm155_vm7 = vcmp.eq.s32.totalorder %v87_v15, %v740_v40 }
  0x96   :  { %vm161_vm14 = vcmp.eq.s32.totalorder %v105_v2, %v740_v40  ;;  %vm169_vm15 = vcmp.eq.s32.totalorder %v129_v3, %v740_v40  ;;  %v515_v21 = vsel %vm155_vm7, 1.0, %v613_v44 }
  0x97   :  { %v521_v5 = vsel %vm161_vm14, 1.0, %v613_v44  ;;  %v529_v6 = vsel %vm169_vm15, 1.0, %v613_v44 }
  0x98   :  { %537 = vmatmul.msk.f32.gmra.mxu0 %vm242_vm0, %v505_v4  ;;  %553 = vmatmul.msk.f32.gmra.mxu2 %vm242_vm0, %v521_v5 }
  0x99   :  { %561 = vmatmul.msk.f32.gmra.mxu3 %vm242_vm0, %v529_v6 }
  0x9c   :  { %v66_v24 = vpop.permute.xlu2 %65 }
  0x9d   :  { %v81_v8 = vpop.permute.xlu0 %80  ;;  %v108_v9 = vpop.permute.xlu1 %107  ;;  %vm148_vm10 = vcmp.eq.s32.totalorder %v66_v24, %v740_v40 }
  0x9e   :  { %vm153_vm2 = vcmp.eq.s32.totalorder %v81_v8, %v740_v40  ;;  %vm162_vm3 = vcmp.eq.s32.totalorder %v108_v9, %v740_v40  ;;  %v508_v27 = vsel %vm148_vm10, 1.0, %v613_v44 }
  0x9f   :  { %v513_v10 = vsel %vm153_vm2, 1.0, %v613_v44  ;;  %v522_v11 = vsel %vm162_vm3, 1.0, %v613_v44 }
  0xa0   :  { %545 = vmatmul.msk.f32.gmra.mxu1 %vm242_vm0, %v513_v10  ;;  %554 = vmatmul.msk.f32.gmra.mxu2 %vm242_vm0, %v522_v11 }
  0xa1   :  { %562 = vmatmul.msk.f32.gmra.mxu3 %vm242_vm0, %v530_v12 }
  0xa4   :  { %v141_v30 = vpop.permute.xlu2 %140 }
  0xa5   :  { %v60_v13 = vpop.permute.xlu0 %59  ;;  %v84_v14 = vpop.permute.xlu1 %83  ;;  %vm173_vm13 = vcmp.eq.s32.totalorder %v141_v30, %v740_v40 }
  0xa6   :  { %vm146_vm5 = vcmp.eq.s32.totalorder %v60_v13, %v740_v40  ;;  %vm154_vm6 = vcmp.eq.s32.totalorder %v84_v14, %v740_v40  ;;  %v533_v35 = vsel %vm173_vm13, 1.0, %v613_v44 }
  0xa7   :  { %v506_v16 = vsel %vm146_vm5, 1.0, %v613_v44  ;;  %v514_v17 = vsel %vm154_vm6, 1.0, %v613_v44 }
  0xa8   :  { %538 = vmatmul.msk.f32.gmra.mxu0 %vm242_vm0, %v506_v16  ;;  %546 = vmatmul.msk.f32.gmra.mxu1 %vm242_vm0, %v514_v17 }
  0xa9   :  { %555 = vmatmul.msk.f32.gmra.mxu2 %vm242_vm0, %v523_v18 }
  0xad   :  { %v135_v19 = vpop.permute.xlu0 %134  ;;  %v63_v20 = vpop.permute.xlu1 %62 }
  0xae   :  { %vm171_vm8 = vcmp.eq.s32.totalorder %v135_v19, %v740_v40  ;;  %vm147_vm9 = vcmp.eq.s32.totalorder %v63_v20, %v740_v40 }
  0xaf   :  { %v531_v22 = vsel %vm171_vm8, 1.0, %v613_v44  ;;  %v507_v23 = vsel %vm147_vm9, 1.0, %v613_v44 }
  0xb0   :  { %539 = vmatmul.msk.f32.gmra.mxu0 %vm242_vm0, %v507_v23  ;;  %547 = vmatmul.msk.f32.gmra.mxu1 %vm242_vm0, %v515_v21 }
  0xb1   :  { %563 = vmatmul.msk.f32.gmra.mxu3 %vm242_vm0, %v531_v22 }
  0xb5   :  { %v114_v25 = vpop.permute.xlu0 %113  ;;  %v138_v26 = vpop.permute.xlu1 %137 }
  0xb6   :  { %vm164_vm11 = vcmp.eq.s32.totalorder %v114_v25, %v740_v40  ;;  %vm172_vm12 = vcmp.eq.s32.totalorder %v138_v26, %v740_v40 }
  0xb7   :  { %v524_v28 = vsel %vm164_vm11, 1.0, %v613_v44  ;;  %v532_v29 = vsel %vm172_vm12, 1.0, %v613_v44 }
  0xb8   :  { %540 = vmatmul.msk.f32.gmra.mxu0 %vm242_vm0, %v508_v27  ;;  %556 = vmatmul.msk.f32.gmra.mxu2 %vm242_vm0, %v524_v28 }
  0xb9   :  { %564 = vmatmul.msk.f32.gmra.mxu3 %vm242_vm0, %v532_v29 }
  0xbd   :  { %v90_v31 = vpop.permute.xlu0 %89  ;;  %v117_v32 = vpop.permute.xlu1 %116 }
  0xbe   :  { %vm156_vm14 = vcmp.eq.s32.totalorder %v90_v31, %v740_v40  ;;  %vm165_vm15 = vcmp.eq.s32.totalorder %v117_v32, %v740_v40 }
  0xbf   :  { %v516_v33 = vsel %vm156_vm14, 1.0, %v613_v44  ;;  %v525_v34 = vsel %vm165_vm15, 1.0, %v613_v44 }
  0xc0   :  { %548 = vmatmul.msk.f32.gmra.mxu1 %vm242_vm0, %v516_v33  ;;  %557 = vmatmul.msk.f32.gmra.mxu2 %vm242_vm0, %v525_v34 }
  0xc1   :  { %565 = vmatmul.msk.f32.gmra.mxu3 %vm242_vm0, %v533_v35 }
  0xc5   :  { %v69_v36 = vpop.permute.xlu0 %68  ;;  %v93_v37 = vpop.permute.xlu1 %92 }
  0xc6   :  { %vm149_vm1 = vcmp.eq.s32.totalorder %v69_v36, %v740_v40  ;;  %vm157_vm2 = vcmp.eq.s32.totalorder %v93_v37, %v740_v40 }
  0xc7   :  { %v509_v38 = vsel %vm149_vm1, 1.0, %v613_v44  ;;  %v517_v39 = vsel %vm157_vm2, 1.0, %v613_v44 }
  0xc8   :  { %541 = vmatmul.msk.f32.gmra.mxu0 %vm242_vm0, %v509_v38  ;;  %549 = vmatmul.msk.f32.gmra.mxu1 %vm242_vm0, %v517_v39 }
  0xf5   :  { %v356_v41 = vpop.f32.mrf.mxu0 }
  0xf6   :  { %452 = vst [vmem:[#allocation2] sm:$0xff] %v356_v41 }
  0xfb   :  { %v404_v42 = vpop.f32.mrf.mxu2 }
  0xfc   :  { %468 = vst [vmem:[#allocation2 + $0x80] sm:$0xff] %v404_v42 }
  0xfd   :  { %v380_v43 = vpop.f32.mrf.mxu1 }
  0xfe   :  { %460 = vst [vmem:[#allocation2 + $0x40] sm:$0xff] %v380_v43 }
 0x103   :  { %v407_v45 = vpop.f32.mrf.mxu2 }
 0x104   :  { %469 = vst [vmem:[#allocation2 + $0x88] sm:$0xff] %v407_v45  ;;  %v428_v46 = vpop.f32.mrf.mxu3 }
 0x105   :  { %476 = vst [vmem:[#allocation2 + $0xc0] sm:$0xff] %v428_v46  ;;  %v359_v47 = vpop.f32.mrf.mxu0  ;;  %v383_v40 = vpop.f32.mrf.mxu1 }
 0x106   :  { %453 = vst [vmem:[#allocation2 + $0x8] sm:$0xff] %v359_v47 }
 0x107   :  { %461 = vst [vmem:[#allocation2 + $0x48] sm:$0xff] %v383_v40 }
 0x10c   :  { %v410_v48 = vpop.f32.mrf.mxu2  ;;  %v431_v44 = vpop.f32.mrf.mxu3 }
 0x10d   :  { %470 = vst [vmem:[#allocation2 + $0x90] sm:$0xff] %v410_v48  ;;  %v362_v49 = vpop.f32.mrf.mxu0  ;;  %v386_v50 = vpop.f32.mrf.mxu1 }
 0x10e   :  { %477 = vst [vmem:[#allocation2 + $0xc8] sm:$0xff] %v431_v44 }
 0x10f   :  { %454 = vst [vmem:[#allocation2 + $0x10] sm:$0xff] %v362_v49 }
 0x110   :  { %462 = vst [vmem:[#allocation2 + $0x50] sm:$0xff] %v386_v50 }
 0x114   :  { %v434_v51 = vpop.f32.mrf.mxu3 }
 0x115   :  { %478 = vst [vmem:[#allocation2 + $0xd0] sm:$0xff] %v434_v51  ;;  %v365_v52 = vpop.f32.mrf.mxu0 }
 0x116   :  { %455 = vst [vmem:[#allocation2 + $0x18] sm:$0xff] %v365_v52 }
 0x11b   :  { %v413_v53 = vpop.f32.mrf.mxu2 }
 0x11c   :  { %471 = vst [vmem:[#allocation2 + $0x98] sm:$0xff] %v413_v53  ;;  %v437_v54 = vpop.f32.mrf.mxu3 }
 0x11d   :  { %479 = vst [vmem:[#allocation2 + $0xd8] sm:$0xff] %v437_v54  ;;  %v389_v55 = vpop.f32.mrf.mxu1 }
 0x11e   :  { %463 = vst [vmem:[#allocation2 + $0x58] sm:$0xff] %v389_v55 }
 0x123   :  { %v416_v56 = vpop.f32.mrf.mxu2 }
 0x124   :  { %472 = vst [vmem:[#allocation2 + $0xa0] sm:$0xff] %v416_v56  ;;  %v440_v57 = vpop.f32.mrf.mxu3 }
 0x125   :  { %480 = vst [vmem:[#allocation2 + $0xe0] sm:$0xff] %v440_v57  ;;  %v368_v58 = vpop.f32.mrf.mxu0  ;;  %v392_v59 = vpop.f32.mrf.mxu1 }
 0x126   :  { %456 = vst [vmem:[#allocation2 + $0x20] sm:$0xff] %v368_v58 }
 0x127   :  { %464 = vst [vmem:[#allocation2 + $0x60] sm:$0xff] %v392_v59 }
 0x12c   :  { %v419_v60 = vpop.f32.mrf.mxu2 }
 0x12d   :  { %473 = vst [vmem:[#allocation2 + $0xa8] sm:$0xff] %v419_v60  ;;  %v371_v61 = vpop.f32.mrf.mxu0  ;;  %v395_v62 = vpop.f32.mrf.mxu1 }
 0x12e   :  { %457 = vst [vmem:[#allocation2 + $0x28] sm:$0xff] %v371_v61 }
 0x12f   :  { %465 = vst [vmem:[#allocation2 + $0x68] sm:$0xff] %v395_v62 }
 0x134   :  { %v443_v63 = vpop.f32.mrf.mxu3 }
 0x135   :  { %481 = vst [vmem:[#allocation2 + $0xe8] sm:$0xff] %v443_v63  ;;  %v374_v0 = vpop.f32.mrf.mxu0 }
 0x136   :  { %458 = vst [vmem:[#allocation2 + $0x30] sm:$0xff] %v374_v0 }
 0x13b   :  { %v422_v1 = vpop.f32.mrf.mxu2 }
 0x13c   :  { %474 = vst [vmem:[#allocation2 + $0xb0] sm:$0xff] %v422_v1  ;;  %v446_v2 = vpop.f32.mrf.mxu3 }
 0x13d   :  { %482 = vst [vmem:[#allocation2 + $0xf0] sm:$0xff] %v446_v2  ;;  %v398_v3 = vpop.f32.mrf.mxu1 }
 0x13e   :  { %466 = vst [vmem:[#allocation2 + $0x70] sm:$0xff] %v398_v3 }
 0x143   :  { %v425_v4 = vpop.f32.mrf.mxu2 }
 0x144   :  { %475 = vst [vmem:[#allocation2 + $0xb8] sm:$0xff] %v425_v4  ;;  %v449_v5 = vpop.f32.mrf.mxu3 }
 0x145   :  { %483 = vst [vmem:[#allocation2 + $0xf8] sm:$0xff] %v449_v5  ;;  %v377_v6 = vpop.f32.mrf.mxu0  ;;  %v401_v7 = vpop.f32.mrf.mxu1 }
 0x146   :  { %459 = vst [vmem:[#allocation2 + $0x38] sm:$0xff] %v377_v6 }
 0x147   :  { %467 = vst [vmem:[#allocation2 + $0x78] sm:$0xff] %v401_v7 }
 0x148   :  { %496 = dma.vmem_to_hbm [thread:$0]  %s489_s1, 4096, %s491_s27, [#allocation3], %s615_s28, %s615_s28, %s616_s29  }
 0x149   :  { %610 = dma.done.wait [#allocation3], 4096  }
 0x14a   :  { %611 = vsyncadd [#allocation3], 4294963200 }
 0x14b   :  { %501 = vsyncpa [#allocation3], 1 }

</bundles_post_ra>
